<compile_context>
chip_gen: v7x
topology: tpu7x:2x2x1
jax: 0.10.0
libtpu: 0.0.40
codegen_flags: <defaults>
</compile_context>

<pallas_src>
import functools
import math

import jax
import jax.numpy as jnp
from jax.experimental import pallas as pl
from jax.experimental.pallas import tpu as pltpu

GAMMA = 2.0
ALPHA = 0.25
EPS = 1e-05

_COLS = 128           # lane width
_SUBLANES = 8         # f32 sublane tile
_MAX_BLK_ROWS = 1024  # rows per grid step (1024 x 128 f32 = 512 KiB / input)


def _round_up(x, m):
    return ((x + m - 1) // m) * m


def _focal_loss_kernel(p_ref, t_ref, o_ref, acc_ref, *, n, gamma, alpha, eps,
                       size_average):
    i = pl.program_id(0)
    nsteps = pl.num_programs(0)

    # Init the resident vector accumulator on the first grid step.
    @pl.when(i == 0)
    def _():
        acc_ref[...] = jnp.zeros_like(acc_ref)

    x = p_ref[...].astype(jnp.float32)
    t = t_ref[...].astype(jnp.float32)

    # log-sigmoid / softplus formulation (3 EUP transcendentals per element):
    #   p        = sigmoid(x) = 1 / (1 + exp(-x))
    #   log(p)   = -log(1 + exp(-x)) = -sp
    #   log(1-p) = -x - sp
    # The reference clamps p to [eps, 1-eps]; that is equivalent to clamping
    # p itself plus clamping both logs into [log(eps), log(1-eps)].
    e = jnp.exp(-x)
    sp = jnp.log(1.0 + e)
    p = 1.0 / (1.0 + e)
    pc = jnp.clip(p, eps, 1.0 - eps)

    log_lo = math.log(eps)
    log_hi = math.log1p(-eps)
    log_p = jnp.clip(-sp, log_lo, log_hi)
    log_1mp = jnp.clip(-x - sp, log_lo, log_hi)

    # gamma is statically 2 in the module: p ** 2 == p * p (jnp.power with a
    # float exponent would lower to exp(gamma*log(p)) -> 2 extra EUP ops/elem).
    g = float(gamma)
    if g == float(int(g)) and 1 <= int(g) <= 4:
        p_pow = pc
        for _ in range(int(g) - 1):
            p_pow = p_pow * pc
    else:
        p_pow = pc ** g

    # Exactly mirrors the PyTorch expression (note: (1 - p) * gamma is a
    # multiply, not a power, and the alpha/(1-alpha) weighting follows the
    # reference module as written).
    loss = (-t * (1.0 - alpha) * ((1.0 - pc) * gamma) * log_p
            - (1.0 - t) * alpha * p_pow * log_1mp)

    blk_rows, cols = loss.shape

    @pl.when(i != nsteps - 1)
    def _():
        # Full interior block: no padding possible -> pure VPU vreg adds.
        acc_ref[...] += loss.reshape(blk_rows // _SUBLANES, _SUBLANES,
                                     cols).sum(axis=0)

    @pl.when(i == nsteps - 1)
    def _():
        # Only the final block can contain padded / out-of-range elements.
        # Mask with a select (NOT a multiply: those lanes may hold NaN/Inf).
        row_idx = (jax.lax.broadcasted_iota(jnp.int32, loss.shape, 0)
                   + i * blk_rows)
        col_idx = jax.lax.broadcasted_iota(jnp.int32, loss.shape, 1)
        flat_idx = row_idx * cols + col_idx
        masked = jnp.where(flat_idx < n, loss, 0.0)
        acc_ref[...] += masked.reshape(blk_rows // _SUBLANES, _SUBLANES,
                                       cols).sum(axis=0)

        total = jnp.sum(acc_ref[...])
        if size_average:
            total = total / float(n)
        o_ref[...] = total.reshape(1, 1)


def focal_loss(predict, target, gamma=GAMMA, alpha=ALPHA, eps=EPS,
               size_average=True):
    assert predict.shape == target.shape
    flat_p = predict.reshape(-1)
    flat_t = target.reshape(-1)
    n = flat_p.size

    # Pad only to the 128-lane width (<= 127 elements, and a no-op for common
    # NCHW sizes); the partial last *row block* is handled by the in-kernel
    # mask, not by wrapper padding (which would cost an extra HBM pass).
    rows = pl.cdiv(n, _COLS)
    pad = rows * _COLS - n
    if pad:
        flat_p = jnp.pad(flat_p, (0, pad))
        flat_t = jnp.pad(flat_t, (0, pad))
    p2 = flat_p.reshape(rows, _COLS)
    t2 = flat_t.reshape(rows, _COLS)

    blk_rows = min(_MAX_BLK_ROWS, _round_up(rows, _SUBLANES))
    num_blocks = pl.cdiv(rows, blk_rows)

    kernel = functools.partial(_focal_loss_kernel, n=n, gamma=float(gamma),
                               alpha=float(alpha), eps=float(eps),
                               size_average=size_average)

    out = pl.pallas_call(
        kernel,
        out_shape=jax.ShapeDtypeStruct((1, 1), jnp.float32),
        grid=(num_blocks,),
        in_specs=[
            pl.BlockSpec((blk_rows, _COLS), lambda i: (i, 0)),
            pl.BlockSpec((blk_rows, _COLS), lambda i: (i, 0)),
        ],
        out_specs=pl.BlockSpec((1, 1), lambda i: (0, 0)),
        scratch_shapes=[pltpu.VMEM((_SUBLANES, _COLS), jnp.float32)],
        compiler_params=pltpu.CompilerParams(
            dimension_semantics=("arbitrary",)),
    )(p2, t2)
    # TODO(synk): on v7x a 2-way "parallel" leading grid axis (half the rows
    # per TensorCore, per-core partial sums combined in the wrapper) would use
    # both EUPs; omitted here to keep the reduction single-axis and simple.
    return out[0, 0]


def _focal_loss_ref(predict, target, gamma=GAMMA, alpha=ALPHA, eps=EPS,
                    size_average=True):
    p = jax.nn.sigmoid(predict.astype(jnp.float32))
    p = jnp.clip(p, eps, 1.0 - eps)
    t = target.astype(jnp.float32)
    loss = (-t * (1.0 - alpha) * ((1.0 - p) * gamma) * jnp.log(p)
            - (1.0 - t) * alpha * (p ** gamma) * jnp.log(1.0 - p))
    return jnp.mean(loss) if size_average else jnp.sum(loss)


if __name__ == "__main__":
    key = jax.random.PRNGKey(0)
    k1, k2 = jax.random.split(key)
    # NCHW-shaped logits and binary targets, small shapes.
    predict = jax.random.normal(k1, (2, 4, 16, 16), dtype=jnp.float32)
    target = (jax.random.uniform(k2, (2, 4, 16, 16)) > 0.5).astype(jnp.float32)

    out = focal_loss(predict, target)
    out = jax.block_until_ready(out)

    ref = _focal_loss_ref(predict, target)
    assert jnp.allclose(out, ref, rtol=2e-5, atol=1e-6), (out, ref)
    print("KERNEL_OK")
</pallas_src>

<mosaic_0001>
module attributes {stable_mosaic.version = 11 : i64} {
  func.func @_focal_loss_kernel(%arg0: i32, %arg1: memref<16x128xf32, #tpu.memory_space<vmem>>, %arg2: memref<16x128xf32, #tpu.memory_space<vmem>>, %arg3: memref<1x1xf32, #tpu.memory_space<vmem>>, %arg4: memref<8x128xf32, #tpu.memory_space<vmem>>) attributes {dimension_semantics = [#tpu.dimension_semantics<arbitrary>], iteration_bounds = array<i64: 1>, scalar_prefetch = 0 : i64, scratch_operands = 1 : i64, tpu.core_type = #tpu.core_type<tc>, window_params = [{transform_indices = @transform_0, window_bounds = array<i64: 16, 128>}, {transform_indices = @transform_1, window_bounds = array<i64: 16, 128>}, {pipeline_mode = #tpu.pipeline_mode<synchronous>, transform_indices = @transform_2, window_bounds = array<i64: 1, 1>}]} {
    %c0_i32 = arith.constant 0 : i32
    %0 = arith.cmpi eq, %arg0, %c0_i32 : i32
    %1 = arith.extui %0 : i1 to i32
    %c0_i32_0 = arith.constant 0 : i32
    %2 = arith.cmpi ne, %1, %c0_i32_0 : i32
    scf.if %2 {
      %cst_25 = arith.constant 0.000000e+00 : f32
      %56 = vector.broadcast %cst_25 : f32 to vector<8x128xf32>
      %c0_26 = arith.constant 0 : index
      %c0_27 = arith.constant 0 : index
      %57 = vector.load %arg4[%c0_26, %c0_27] : memref<8x128xf32, #tpu.memory_space<vmem>>, vector<8x128xf32>
      tpu.vector_store %arg4[%c0_26, %c0_27], %56 {strides = array<i32>} : memref<8x128xf32, #tpu.memory_space<vmem>>, vector<8x128xf32>,
    } else {
    }
    %c0 = arith.constant 0 : index
    %c0_1 = arith.constant 0 : index
    %3 = vector.load %arg1[%c0, %c0_1] : memref<16x128xf32, #tpu.memory_space<vmem>>, vector<16x128xf32>
    %c0_2 = arith.constant 0 : index
    %c0_3 = arith.constant 0 : index
    %4 = vector.load %arg2[%c0_2, %c0_3] : memref<16x128xf32, #tpu.memory_space<vmem>>, vector<16x128xf32>
    %cst = arith.constant 0.000000e+00 : f32
    %5 = vector.broadcast %cst : f32 to vector<16x128xf32>
    %6 = arith.subf %5, %3 : vector<16x128xf32>
    %7 = math.exp %6 : vector<16x128xf32>
    %cst_4 = arith.constant 1.000000e+00 : f32
    %8 = vector.broadcast %cst_4 : f32 to vector<16x128xf32>
    %9 = arith.addf %8, %7 : vector<16x128xf32>
    %10 = math.log %9 : vector<16x128xf32>
    %cst_5 = arith.constant 1.000000e+00 : f32
    %11 = vector.broadcast %cst_5 : f32 to vector<16x128xf32>
    %12 = arith.addf %11, %7 : vector<16x128xf32>
    %cst_6 = arith.constant 1.000000e+00 : f32
    %13 = vector.broadcast %cst_6 : f32 to vector<16x128xf32>
    %14 = arith.divf %13, %12 : vector<16x128xf32>
    %cst_7 = arith.constant 9.99999974E-6 : f32
    %cst_8 = arith.constant 0.999989986 : f32
    %15 = vector.broadcast %cst_7 : f32 to vector<16x128xf32>
    %16 = arith.maximumf %15, %14 : vector<16x128xf32>
    %17 = vector.broadcast %cst_8 : f32 to vector<16x128xf32>
    %18 = arith.minimumf %17, %16 : vector<16x128xf32>
    %cst_9 = arith.constant 0.000000e+00 : f32
    %19 = vector.broadcast %cst_9 : f32 to vector<16x128xf32>
    %20 = arith.subf %19, %10 : vector<16x128xf32>
    %cst_10 = arith.constant -11.5129251 : f32
    %cst_11 = arith.constant -1.00000498E-5 : f32
    %21 = vector.broadcast %cst_10 : f32 to vector<16x128xf32>
    %22 = arith.maximumf %21, %20 : vector<16x128xf32>
    %23 = vector.broadcast %cst_11 : f32 to vector<16x128xf32>
    %24 = arith.minimumf %23, %22 : vector<16x128xf32>
    %cst_12 = arith.constant 0.000000e+00 : f32
    %25 = vector.broadcast %cst_12 : f32 to vector<16x128xf32>
    %26 = arith.subf %25, %3 : vector<16x128xf32>
    %27 = arith.subf %26, %10 : vector<16x128xf32>
    %cst_13 = arith.constant -11.5129251 : f32
    %cst_14 = arith.constant -1.00000498E-5 : f32
    %28 = vector.broadcast %cst_13 : f32 to vector<16x128xf32>
    %29 = arith.maximumf %28, %27 : vector<16x128xf32>
    %30 = vector.broadcast %cst_14 : f32 to vector<16x128xf32>
    %31 = arith.minimumf %30, %29 : vector<16x128xf32>
    %32 = arith.mulf %18, %18 : vector<16x128xf32>
    %cst_15 = arith.constant 0.000000e+00 : f32
    %33 = vector.broadcast %cst_15 : f32 to vector<16x128xf32>
    %34 = arith.subf %33, %4 : vector<16x128xf32>
    %cst_16 = arith.constant 7.500000e-01 : f32
    %35 = vector.broadcast %cst_16 : f32 to vector<16x128xf32>
    %36 = arith.mulf %34, %35 : vector<16x128xf32>
    %cst_17 = arith.constant 1.000000e+00 : f32
    %37 = vector.broadcast %cst_17 : f32 to vector<16x128xf32>
    %38 = arith.subf %37, %18 : vector<16x128xf32>
    %cst_18 = arith.constant 2.000000e+00 : f32
    %39 = vector.broadcast %cst_18 : f32 to vector<16x128xf32>
    %40 = arith.mulf %38, %39 : vector<16x128xf32>
    %41 = arith.mulf %36, %40 : vector<16x128xf32>
    %42 = arith.mulf %41, %24 : vector<16x128xf32>
    %cst_19 = arith.constant 1.000000e+00 : f32
    %43 = vector.broadcast %cst_19 : f32 to vector<16x128xf32>
    %44 = arith.subf %43, %4 : vector<16x128xf32>
    %cst_20 = arith.constant 2.500000e-01 : f32
    %45 = vector.broadcast %cst_20 : f32 to vector<16x128xf32>
    %46 = arith.mulf %44, %45 : vector<16x128xf32>
    %47 = arith.mulf %46, %32 : vector<16x128xf32>
    %48 = arith.mulf %47, %31 : vector<16x128xf32>
    %49 = arith.subf %42, %48 : vector<16x128xf32>
    %c0_i32_21 = arith.constant 0 : i32
    %50 = arith.cmpi ne, %arg0, %c0_i32_21 : i32
    %51 = arith.extui %50 : i1 to i32
    %c0_i32_22 = arith.constant 0 : i32
    %52 = arith.cmpi ne, %51, %c0_i32_22 : i32
    scf.if %52 {
      %c0_25 = arith.constant 0 : index
      %c0_26 = arith.constant 0 : index
      %56 = vector.load %arg4[%c0_25, %c0_26] : memref<8x128xf32, #tpu.memory_space<vmem>>, vector<8x128xf32>
      %57 = vector.shape_cast %49 : vector<16x128xf32> to vector<2x8x128xf32>
      %cst_27 = arith.constant dense<0.000000e+00> : vector<8x128xf32>
      %58 = vector.multi_reduction <add>, %57, %cst_27 [0] : vector<2x8x128xf32> to vector<8x128xf32>
      %59 = arith.addf %56, %58 : vector<8x128xf32>
      %c0_28 = arith.constant 0 : index
      %c0_29 = arith.constant 0 : index
      %60 = vector.load %arg4[%c0_28, %c0_29] : memref<8x128xf32, #tpu.memory_space<vmem>>, vector<8x128xf32>
      tpu.vector_store %arg4[%c0_28, %c0_29], %59 {strides = array<i32>} : memref<8x128xf32, #tpu.memory_space<vmem>>, vector<8x128xf32>,
    } else {
    }
    %c0_i32_23 = arith.constant 0 : i32
    %53 = arith.cmpi eq, %arg0, %c0_i32_23 : i32
    %54 = arith.extui %53 : i1 to i32
    %c0_i32_24 = arith.constant 0 : i32
    %55 = arith.cmpi ne, %54, %c0_i32_24 : i32
    scf.if %55 {
      %56 = tpu.iota {dimensions = array<i32: 0>} : vector<16x128xi32>
      %c16_i32 = arith.constant 16 : i32
      %57 = arith.muli %arg0, %c16_i32 : i32
      %58 = vector.broadcast %57 : i32 to vector<16x128xi32>
      %59 = arith.addi %56, %58 : vector<16x128xi32>
      %60 = tpu.iota {dimensions = array<i32: 1>} : vector<16x128xi32>
      %c128_i32 = arith.constant 128 : i32
      %61 = vector.broadcast %c128_i32 : i32 to vector<16x128xi32>
      %62 = arith.muli %59, %61 : vector<16x128xi32>
      %63 = arith.addi %62, %60 : vector<16x128xi32>
      %c2048_i32 = arith.constant 2048 : i32
      %64 = vector.broadcast %c2048_i32 : i32 to vector<16x128xi32>
      %65 = arith.cmpi slt, %63, %64 : vector<16x128xi32>
      %cst_25 = arith.constant 0.000000e+00 : f32
      %66 = vector.broadcast %cst_25 : f32 to vector<16x128xf32>
      %67 = arith.select %65, %49, %66 : vector<16x128xi1>, vector<16x128xf32>
      %c0_26 = arith.constant 0 : index
      %c0_27 = arith.constant 0 : index
      %68 = vector.load %arg4[%c0_26, %c0_27] : memref<8x128xf32, #tpu.memory_space<vmem>>, vector<8x128xf32>
      %69 = vector.shape_cast %67 : vector<16x128xf32> to vector<2x8x128xf32>
      %cst_28 = arith.constant dense<0.000000e+00> : vector<8x128xf32>
      %70 = vector.multi_reduction <add>, %69, %cst_28 [0] : vector<2x8x128xf32> to vector<8x128xf32>
      %71 = arith.addf %68, %70 : vector<8x128xf32>
      %c0_29 = arith.constant 0 : index
      %c0_30 = arith.constant 0 : index
      %72 = vector.load %arg4[%c0_29, %c0_30] : memref<8x128xf32, #tpu.memory_space<vmem>>, vector<8x128xf32>
      tpu.vector_store %arg4[%c0_29, %c0_30], %71 {strides = array<i32>} : memref<8x128xf32, #tpu.memory_space<vmem>>, vector<8x128xf32>,
      %c0_31 = arith.constant 0 : index
      %c0_32 = arith.constant 0 : index
      %73 = vector.load %arg4[%c0_31, %c0_32] : memref<8x128xf32, #tpu.memory_space<vmem>>, vector<8x128xf32>
      %74 = vector.shape_cast %73 : vector<8x128xf32> to vector<1x8x128xf32>
      %cst_33 = arith.constant dense<0.000000e+00> : vector<1xf32>
      %75 = vector.multi_reduction <add>, %74, %cst_33 [1, 2] : vector<1x8x128xf32> to vector<1xf32>
      %76 = vector.shape_cast %75 : vector<1xf32> to vector<1x1x1xf32>
      %77 = vector.extract %76[0, 0, 0] : f32 from vector<1x1x1xf32>
      %cst_34 = arith.constant 2.048000e+03 : f32
      %78 = arith.divf %77, %cst_34 : f32
      %79 = vector.broadcast %78 : f32 to vector<1x1xf32>
      %c0_35 = arith.constant 0 : index
      %c0_36 = arith.constant 0 : index
      %80 = vector.load %arg3[%c0_35, %c0_36] : memref<1x1xf32, #tpu.memory_space<vmem>>, vector<1x1xf32>
      tpu.vector_store %arg3[%c0_35, %c0_36], %79 {strides = array<i32>} : memref<1x1xf32, #tpu.memory_space<vmem>>, vector<1x1xf32>,
    } else {
    }
    return
  }
  func.func @transform_0(%arg0: i32) -> (i32, i32) {
    %c0_i32 = arith.constant 0 : i32
    %c0_i32_0 = arith.constant 0 : i32
    return %arg0, %c0_i32 : i32, i32
  }
  func.func @transform_1(%arg0: i32) -> (i32, i32) {
    %c0_i32 = arith.constant 0 : i32
    %c0_i32_0 = arith.constant 0 : i32
    return %arg0, %c0_i32 : i32, i32
  }
  func.func @transform_2(%arg0: i32) -> (i32, i32) {
    %c0_i32 = arith.constant 0 : i32
    %c0_i32_0 = arith.constant 0 : i32
    %c0_i32_1 = arith.constant 0 : i32
    return %c0_i32, %c0_i32_0 : i32, i32
  }
}

</mosaic_0001>

<bundles_post_ra>
// kernel: tpu_custom_call.1
= control target key start
LH: loop header
LB: loop body
LE: loop exit
PB: predicated region body
PF: predicated region fallthrough
CT: control target
= control target key end

     0   :  { %7 = vsyncpa [#allocation4], 0  ;;  %s316_s0 = inlined_call_operand.hbm [shape: f32[16,128], index: 0, kind: input, shape index: {}]   ;;  %s317_s1 = inlined_call_operand.hbm [shape: f32[16,128], index: 1, kind: input, shape index: {}]   ;;  %s318_s2 = inlined_call_operand.hbm [shape: f32[1,1], index: 2, kind: output, shape index: {}]  }
   0x1   :  { %8 = vsyncpa [#allocation7], 0 }
   0x2   :  { %9 = vsyncpa [#allocation5], 0  ;;  %s260_s9 = smov [#allocation3]   ;;  %s188_s13 = scalar_lea.hbm %s316_s0, 256 }
   0x3   :  { %s15_s10 = sshll.u32 %s260_s9, 4  ;;  %p189_p0 = scmp.ne.s32.totalorder %s316_s0, %s188_s13  ;;  %s16_s10 = int_to_ptr.vmem [resolvable:$true] %s15_s10 }
   0x4   :  { %p192_p1 = scmp.lt.u32.totalorder %s188_s13, %s316_s0 }
   0x6   :  { %p194_p2 = pnand %p192_p1, %p189_p0 }
   0x8   :  { %197 = shalt.err (!%p194_p2)
}
   0x9   :  { %s198_s18 = scalar_lea.vmem %s16_s10, 256  ;;  %p203_p4 = scmp.lt.s32.totalorder %s16_s10, %s16_s10 }
   0xa   :  { %p199_p3 = scmp.ne.s32.totalorder %s16_s10, %s198_s18  ;;  %p204_p5 = scmp.lt.s32.totalorder %s198_s18, %s198_s18 }
   0xc   :  { %p205_p6 = por %p204_p5, %p203_p4 }
   0xe   :  { %p206_p7 = pnand %p205_p6, %p199_p3 }
  0x10   :  { %209 = shalt.err (!%p206_p7)
}
  0x11   :  { %s261_s19 = smov 128   ;;  %s262_s20 = smov 8  }
  0x12   :  { %21 = dma.hbm_to_vmem [thread:$0]  %s316_s0, 256, %s16_s10, [#allocation4], %s261_s19, %s261_s19, %s262_s20  }
  0x13   :  { %s263_s23 = smov [#allocation6]   ;;  %s210_s27 = scalar_lea.hbm %s317_s1, 256 }
  0x14   :  { %s27_s24 = sshll.u32 %s263_s23, 4  ;;  %p211_p8 = scmp.ne.s32.totalorder %s317_s1, %s210_s27  ;;  %s28_s24 = int_to_ptr.vmem [resolvable:$true] %s27_s24 }
  0x15   :  { %p214_p9 = scmp.lt.u32.totalorder %s210_s27, %s317_s1 }
  0x17   :  { %p216_p10 = pnand %p214_p9, %p211_p8 }
  0x19   :  { %219 = shalt.err (!%p216_p10)
}
  0x1a   :  { %s220_s4 = scalar_lea.vmem %s28_s24, 256  ;;  %p225_p12 = scmp.lt.s32.totalorder %s28_s24, %s28_s24 }
  0x1b   :  { %p221_p11 = scmp.ne.s32.totalorder %s28_s24, %s220_s4  ;;  %p226_p13 = scmp.lt.s32.totalorder %s220_s4, %s220_s4 }
  0x1d   :  { %p227_p0 = por %p226_p13, %p225_p12 }
  0x1f   :  { %p228_p1 = pnand %p227_p0, %p221_p11 }
  0x21   :  { %231 = shalt.err (!%p228_p1)
}
  0x22   :  { %33 = dma.hbm_to_vmem [thread:$0]  %s317_s1, 256, %s28_s24, [#allocation7], %s261_s19, %s261_s19, %s262_s20  }
  0x23   :  { %254 = dma.done.wait [#allocation4], 256  }
  0x24   :  { %255 = vsyncadd [#allocation4], 4294967040 }
  0x25   :  { %256 = dma.done.wait [#allocation7], 256  }
  0x26   :  { %257 = vsyncadd [#allocation7], 4294967040  ;;  %v45_v0 = vld [vmem:[#allocation3] sm:$0xff]  ;;  %v46_v1 = vld [vmem:[#allocation3 + $0x8] sm:$0xff]  ;;  %v116_v10 = vlaneseq  ;;  %s264_s1 = smov [#allocation8]   ;;  %vm151_vm2 = vcmask 0  }
  0x27   :  { %v49_v2 = vsub.f32 0.0, %v45_v0  ;;  %v50_v3 = vsub.f32 0.0, %v46_v1  ;;  %v47_v12 = vld [vmem:[#allocation6] sm:$0xff]  ;;  %v48_v13 = vld [vmem:[#allocation6 + $0x8] sm:$0xff]  ;;  %s159_s6 = sshll.u32 %s264_s1, 4  ;;  %s160_s6 = int_to_ptr.vmem [resolvable:$true] %s159_s6 }
  0x28   :  { %v117_v11 = vshrl.u32 %v116_v10, 7  ;;  %v95_v15 = vsub.f32 1.0, %v47_v12  ;;  %v96_v17 = vsub.f32 1.0, %v48_v13  ;;  %v124_v20 = vand.u32 127, %v116_v10  ;;  %s232_s9 = scalar_lea.vmem %s160_s6, 16  ;;  %s236_s10 = scalar_lea.vmem %s160_s6, 32 }
  0x29   :  { %v51_v4 = vmul.f32 1.442695, %v49_v2  ;;  %v53_v5 = vmul.f32 1.442695, %v50_v3  ;;  %v83_v24 = vsub.f32 0.0, %v47_v12  ;;  %v84_v25 = vsub.f32 0.0, %v48_v13  ;;  %p233_p2 = scmp.ne.s32.totalorder %s160_s6, %s232_s9  ;;  %p237_p3 = scmp.lt.s32.totalorder %s160_s6, %s160_s6 }
  0x2a   :  { %v118_v14 = vadd.s32 8, %v117_v11  ;;  %v125_v21 = vmul.u32 128, %v117_v11  ;;  %v97_v31 = vmul.f32 0.25, %v95_v15  ;;  %v98_v35 = vmul.f32 0.25, %v96_v17  ;;  %p238_p4 = scmp.lt.s32.totalorder %s236_s10, %s232_s9 }
  0x2b   :  { %176 = vpow2.f32 %v51_v4  ;;  %v85_v44 = vmul.f32 0.75, %v83_v24  ;;  %v86_v48 = vmul.f32 0.75, %v84_v25 }
  0x2c   :  { %178 = vpow2.f32 %v53_v5  ;;  %v126_v26 = vmul.u32 128, %v118_v14  ;;  %v127_v56 = vadd.s32 %v125_v21, %v124_v20  ;;  %p239_p5 = por %p238_p4, %p237_p3 }
  0x2e   :  { %v128_v59 = vadd.s32 %v126_v26, %v124_v20  ;;  %vm129_vm0 = vcmp.lt.s32.totalorder %v127_v56, 2048  ;;  %p240_p6 = pnand %p239_p5, %p233_p2 }
  0x30   :  { %vm130_vm1 = vcmp.lt.s32.totalorder %v128_v59, 2048 }
  0x35   :  { %v177_v6 = vpop.eup %176 }
  0x36   :  { %v179_v7 = vpop.eup %178  ;;  %v55_v8 = vadd.f32 1.0, %v177_v6 }
  0x37   :  { %v56_v9 = vadd.f32 1.0, %v179_v7 }
  0x38   :  { %180 = vlog2.f32 %v55_v8 }
  0x39   :  { %182 = vlog2.f32 %v56_v9 }
  0x3a   :  { %184 = vrcp.f32 %v55_v8 }
  0x3b   :  { %186 = vrcp.f32 %v56_v9 }
  0x42   :  { %v181_v16 = vpop.eup %180 }
  0x43   :  { %v183_v18 = vpop.eup %182  ;;  %v58_v19 = vmul.f32 0.6931472, %v181_v16 }
  0x44   :  { %v185_v22 = vpop.eup %184  ;;  %v60_v23 = vmul.f32 0.6931472, %v183_v18 }
  0x45   :  { %v187_v27 = vpop.eup %186  ;;  %v65_v28 = vmax.f32 %v185_v22, 1e-05  ;;  %v69_v29 = vsub.f32 0.0, %v58_v19  ;;  %v75_v30 = vsub.f32 %v49_v2, %v58_v19 }
  0x46   :  { %v66_v32 = vmax.f32 %v187_v27, 1e-05  ;;  %v70_v33 = vsub.f32 0.0, %v60_v23  ;;  %v76_v34 = vsub.f32 %v50_v3, %v60_v23 }
  0x47   :  { %v67_v36 = vmin.f32 %v65_v28, 0.99999  ;;  %v71_v37 = vmax.f32 %v69_v29, -11.512925  ;;  %v77_v38 = vmax.f32 %v75_v30, -11.512925 }
  0x48   :  { %v68_v39 = vmin.f32 %v66_v32, 0.99999  ;;  %v72_v40 = vmax.f32 %v70_v33, -11.512925  ;;  %v78_v41 = vmax.f32 %v76_v34, -11.512925 }
  0x49   :  { %v79_v42 = vmin.f32 %v77_v38, -1.000005e-05  ;;  %v81_v43 = vmul.f32 %v67_v36, %v67_v36  ;;  %v87_v45 = vsub.f32 1.0, %v67_v36  ;;  %v73_v50 = vmin.f32 %v71_v37, -1.000005e-05 }
  0x4a   :  { %v80_v46 = vmin.f32 %v78_v41, -1.000005e-05  ;;  %v82_v47 = vmul.f32 %v68_v39, %v68_v39  ;;  %v88_v49 = vsub.f32 1.0, %v68_v39  ;;  %v74_v53 = vmin.f32 %v72_v40, -1.000005e-05 }
  0x4b   :  { %v89_v51 = vmul.f32 2.0, %v87_v45  ;;  %v99_v52 = vmul.f32 %v97_v31, %v81_v43 }
  0x4c   :  { %v90_v54 = vmul.f32 2.0, %v88_v49  ;;  %v100_v55 = vmul.f32 %v98_v35, %v82_v47 }
  0x4d   :  { %v91_v57 = vmul.f32 %v89_v51, %v85_v44  ;;  %v101_v58 = vmul.f32 %v99_v52, %v79_v42 }
  0x4e   :  { %v92_v60 = vmul.f32 %v90_v54, %v86_v48  ;;  %v102_v61 = vmul.f32 %v100_v55, %v80_v46 }
  0x4f   :  { %v93_v62 = vmul.f32 %v91_v57, %v73_v50 }
  0x50   :  { %v94_v63 = vmul.f32 %v92_v60, %v74_v53 }
  0x51   :  { %v103_v0 = vsub.f32 %v93_v62, %v101_v58 }
  0x52   :  { %v104_v1 = vsub.f32 %v94_v63, %v102_v61 }
  0x53   :  { %v131_v2 = vsel %vm129_vm0, %v103_v0, 0.0 }
  0x54   :  { %v132_v3 = vsel %vm130_vm1, %v104_v1, 0.0 }
  0x55   :  { %v134_v4 = vadd.f32 %v132_v3, %v131_v2 }
  0x57   :  { %138 = vadd.xlane.f32.xlu0 %v134_v4 }
  0xe4   :  { %v139_v5 = vpop.xlane.xlu0 %138 }
  0xe5   :  { %v140_v6 = vrot.slane %v139_v5, 4 }
  0xe7   :  { %v141_v7 = vadd.f32 %v140_v6, %v139_v5 }
  0xe9   :  { %v142_v8 = vrot.slane %v141_v7, 2 }
  0xeb   :  { %v143_v9 = vadd.f32 %v142_v8, %v141_v7 }
  0xed   :  { %v144_v10 = vrot.slane %v143_v9, 1 }
  0xef   :  { %v145_v11 = vadd.f32 %v144_v10, %v143_v9 }
  0xf1   :  { %169 = vpush %v145_v11 }
 0x122   :  { %s170_s7 = spop %169 }
 0x123   :  { %s149_s8 = smul.f32 0.00048828125, %s170_s7 }
 0x125   :  { %v150_v12 = vstv %s149_s8 }
 0x126   :  { %152 = vst.msk [vmem:[#allocation8] sm:$0x1] %vm151_vm2, %v150_v12 }
 0x127   :  { %243 = shalt.err (!%p240_p6)
}
 0x128   :  { %s244_s13 = scalar_lea.hbm %s318_s2, 16 }
 0x129   :  { %p245_p7 = scmp.ne.s32.totalorder %s318_s2, %s244_s13  ;;  %p248_p8 = scmp.lt.u32.totalorder %s244_s13, %s318_s2 }
 0x12b   :  { %p250_p9 = pnand %p248_p8, %p245_p7 }
 0x12d   :  { %253 = shalt.err (!%p250_p9)
}
 0x12e   :  { %162 = dma.vmem_to_hbm [thread:$0]  %s160_s6, 16, %s318_s2, [#allocation5]  }
 0x12f   :  { %258 = dma.done.wait [#allocation5], 16  }
 0x130   :  { %259 = vsyncadd [#allocation5], 4294967280 }
 0x131   :  { %166 = vsyncpa [#allocation4], 1 }
 0x132   :  { %167 = vsyncpa [#allocation7], 1 }
 0x133   :  { %168 = vsyncpa [#allocation5], 1 }

</bundles_post_ra>
